<compile_context>
chip_gen: v6e
topology: v6e:2x2x1
jax: 0.10.0
libtpu: 0.0.40
codegen_flags: <defaults>
</compile_context>

<pallas_src>
import functools

import jax
import jax.numpy as jnp
from jax.experimental import pallas as pl
from jax.experimental.pallas import tpu as pltpu


def _round_up(x, m):
    return (x + m - 1) // m * m


def _vmem_capacity_bytes():
    """Per-TensorCore VMEM capacity.

    On v7x (2 TensorCores / chip, 64 MiB each) the query is clamped to the
    per-core figure in case it reports per-chip VMEM; otherwise the fused path
    could be admitted with 2x the real budget (spills / compile failure).
    """
    cap = None
    try:
        cap = int(pltpu.get_tpu_info().vmem_capacity_bytes)
    except Exception:
        cap = None
    try:
        kind = jax.devices()[0].device_kind.lower()
    except Exception:
        kind = ""
    if "v7" in kind:
        cap = (64 << 20) if cap is None else min(cap, 64 << 20)
    if cap is None:
        cap = 64 << 20  # conservative fallback = v7x per-core VMEM
    return cap


def _pick_bt(B, slab_bytes, per_block_cap, bt_cap=16):
    """Largest divisor of B whose (Bt, C, HW) block fits `per_block_cap`,
    capped so the grid keeps >= 2 steps when B >= 2 (v7x has 2 TensorCores)."""
    best = 1
    for bt in range(1, min(B, bt_cap) + 1):
        if B % bt == 0 and bt * slab_bytes <= per_block_cap:
            best = bt
    if B >= 2 and B // best < 2:
        for bt in range(B // 2, 0, -1):
            if B % bt == 0 and bt <= bt_cap:
                best = bt
                break
    return best


# ---------------------------------------------------------------------------
# Fused path: Bt batches per grid step; x is read from HBM exactly once.
# ---------------------------------------------------------------------------
def _se_fused_kernel(x_ref, w1_ref, b1_ref, w2_ref, b2_ref, o_ref, *, inv_hw, bt):
    # x_ref / o_ref: (Bt, C, HW) in x's native dtype (no full-tile f32 copy).
    # Per-batch pooled sums assembled as lane columns of a (C, Bt) matrix so
    # both FCs run as ONE batched dot each instead of Bt separate GEMVs.
    cols = [jnp.sum(x_ref[b], axis=-1, keepdims=True, dtype=jnp.float32)
            for b in range(bt)]
    pooled = (cols[0] if bt == 1 else jnp.concatenate(cols, axis=-1)) * inv_hw
    h = jnp.dot(w1_ref[...], pooled,
                preferred_element_type=jnp.float32) + b1_ref[...]     # (hidden, Bt)
    h = jnp.maximum(h, 0.0)
    g = jnp.dot(w2_ref[...], h,
                preferred_element_type=jnp.float32) + b2_ref[...]     # (C, Bt)
    g = jax.nn.sigmoid(g)

    # Scale: broadcast each batch's (C, 1) gate column over the lanes.  Only
    # the tiny gate is cast; the multiply runs in x's native dtype.
    if bt == 1:
        o_ref[0] = x_ref[0] * g.astype(o_ref.dtype)
    else:
        lane = jax.lax.broadcasted_iota(jnp.int32, g.shape, 1)        # (C, Bt)
        for b in range(bt):
            # Extract column b as (C, 1) via a masked lane-reduce (tiny, VPU/XLU;
            # avoids an unaligned minor-dim slice relayout).
            gb = jnp.sum(jnp.where(lane == b, g, 0.0), axis=-1, keepdims=True)
            o_ref[b] = x_ref[b] * gb.astype(o_ref.dtype)


# ---------------------------------------------------------------------------
# Two-pass fallback (only when the per-batch slab exceeds the VMEM budget).
# ---------------------------------------------------------------------------
def _se_pool_kernel(x_ref, sum_ref, *, hw, t_lanes):
    t = pl.program_id(1)

    @pl.when(t == 0)
    def _():
        sum_ref[...] = jnp.zeros_like(sum_ref)

    x = x_ref[...].astype(jnp.float32)                        # (C, t_lanes)
    # Mask the ragged last tile: the block may extend past HW and the
    # out-of-bounds lanes hold garbage that must not enter the mean.
    col = jax.lax.broadcasted_iota(jnp.int32, x.shape, 1) + t * t_lanes
    x = jnp.where(col < hw, x, 0.0)
    sum_ref[...] += jnp.sum(x, axis=-1, keepdims=True)


def _se_scale_kernel(x_ref, g_ref, o_ref):
    # Ragged last tile: OOB input lanes hold garbage but the corresponding
    # output stores are masked by Pallas, so no masking is needed here.
    o_ref[...] = x_ref[...] * g_ref[...].astype(o_ref.dtype)


# ---------------------------------------------------------------------------
# Wrapper
# ---------------------------------------------------------------------------
def squeeze_excitation(x, w1, b1, w2, b2, *, force_two_pass=False,
                       donate_x=False, _two_pass_tile_lanes=None):
    """x: (B, C, H, W); w1: (hidden, C); b1: (hidden,); w2: (C, hidden); b2: (C,)."""
    B, C, H, W = x.shape
    hidden = w1.shape[0]
    HW = H * W
    inv_hw = 1.0 / HW
    itemsize = x.dtype.itemsize
    x_flat = x.reshape(B, C, HW)                 # pure metadata, no HBM copy

    vmem_cap = _vmem_capacity_bytes()
    budget = int(vmem_cap * 0.85)                # weights are tiny; keep headroom

    # VMEM footprint of one per-batch (C, HW) slab in x's tiled layout.
    sub = max(1, 32 // itemsize)                 # sublane multiple for this dtype
    slab = _round_up(C, sub) * _round_up(HW, 128) * itemsize
    w_bytes = sum(int(a.size) * a.dtype.itemsize for a in (w1, b1, w2, b2))
    headroom = 2 << 20

    # Weights oriented so the gate comes out as lane columns (C, Bt).
    b1_m = b1.reshape(hidden, 1)
    b2_m = b2.reshape(C, 1)

    fused_bufs = 0
    if not force_two_pass:
        if 4 * slab + 2 * w_bytes + headroom <= budget:
            fused_bufs = 2                       # double-buffered input and output
        elif 3 * slab + 2 * w_bytes + headroom <= budget:
            fused_bufs = 1                       # single-buffer output: still only
                                                 # 2 HBM passes (vs 3 for two-pass)

    if fused_bufs:
        # -------------------- fused single-read path --------------------
        if fused_bufs == 2:
            per_block_cap = max(slab, (budget - 2 * w_bytes - headroom) // 4)
            bt = _pick_bt(B, slab, per_block_cap)
        else:
            bt = 1                               # right at the VMEM boundary
        nb = B // bt
        need = (2 + fused_bufs) * bt * slab + 2 * w_bytes + headroom
        vmem_limit = int(min(vmem_cap * 0.98, max(need, 32 << 20)))

        if fused_bufs == 1:
            out_spec = pl.BlockSpec((bt, C, HW), lambda i: (i, 0, 0),
                                    pipeline_mode=pl.Buffered(1))
        else:
            out_spec = pl.BlockSpec((bt, C, HW), lambda i: (i, 0, 0))

        kernel = functools.partial(_se_fused_kernel, inv_hw=inv_hw, bt=bt)
        out = pl.pallas_call(
            kernel,
            out_shape=jax.ShapeDtypeStruct((B, C, HW), x.dtype),
            grid_spec=pltpu.PrefetchScalarGridSpec(
                num_scalar_prefetch=0,
                grid=(nb,),
                in_specs=[
                    pl.BlockSpec((bt, C, HW), lambda i: (i, 0, 0)),
                    pl.BlockSpec((hidden, C), lambda i: (0, 0)),
                    pl.BlockSpec((hidden, 1), lambda i: (0, 0)),
                    pl.BlockSpec((C, hidden), lambda i: (0, 0)),
                    pl.BlockSpec((C, 1), lambda i: (0, 0)),
                ],
                out_specs=out_spec,
            ),
            compiler_params=pltpu.CompilerParams(
                dimension_semantics=("parallel",),
                vmem_limit_bytes=vmem_limit,
            ),
            cost_estimate=pl.CostEstimate(
                flops=2 * B * C * HW + 4 * B * C * hidden,
                transcendentals=B * C,
                bytes_accessed=2 * B * C * HW * itemsize + w_bytes,
            ),
            input_output_aliases=({0: 0} if donate_x else {}),
        )(x_flat, w1, b1_m, w2, b2_m)
        return out.reshape(B, C, H, W)

    # -------------------- two-pass streaming fallback --------------------
    # Lane-dense spatial tiles; bigger on v5e/v6e (128 MiB VMEM) than v7x (64 MiB).
    if _two_pass_tile_lanes is not None:
        t_lanes = _two_pass_tile_lanes
    else:
        target_block_bytes = (16 << 20) if vmem_cap >= (96 << 20) else (4 << 20)
        c_row_bytes = _round_up(C, sub) * itemsize
        t_lanes = max(128, (target_block_bytes // c_row_bytes) // 128 * 128)
    if t_lanes >= HW:
        t_lanes = HW                             # single full-extent tile
    n_t = (HW + t_lanes - 1) // t_lanes

    tile_bytes = _round_up(C, sub) * _round_up(t_lanes, 128) * itemsize
    vmem_limit = int(min(vmem_cap * 0.95,
                         max(6 * tile_bytes + (4 << 20), 32 << 20)))

    pool_kernel = functools.partial(_se_pool_kernel, hw=HW, t_lanes=t_lanes)
    sums = pl.pallas_call(
        pool_kernel,
        out_shape=jax.ShapeDtypeStruct((B, C, 1), jnp.float32),
        grid_spec=pltpu.PrefetchScalarGridSpec(
            num_scalar_prefetch=0,
            grid=(B, n_t),
            in_specs=[pl.BlockSpec((None, C, t_lanes), lambda b, t: (b, 0, t))],
            out_specs=pl.BlockSpec((None, C, 1), lambda b, t: (b, 0, 0)),
        ),
        compiler_params=pltpu.CompilerParams(
            dimension_semantics=("parallel", "arbitrary"),
            vmem_limit_bytes=vmem_limit,
        ),
        cost_estimate=pl.CostEstimate(
            flops=B * C * HW, transcendentals=0,
            bytes_accessed=B * C * HW * itemsize + B * C * 4,
        ),
    )(x_flat)

    # Tiny FC + sigmoid gate on the pooled (B, C) vector in plain JAX: keeps
    # the weights and the gate dead code out of the streaming loops.
    pooled = sums.reshape(B, C) * inv_hw
    h = jnp.maximum(pooled @ w1.astype(jnp.float32).T + b1.astype(jnp.float32), 0.0)
    g = jax.nn.sigmoid(h @ w2.astype(jnp.float32).T + b2.astype(jnp.float32))
    gates = g.reshape(B, C, 1)

    out = pl.pallas_call(
        _se_scale_kernel,
        out_shape=jax.ShapeDtypeStruct((B, C, HW), x.dtype),
        grid_spec=pltpu.PrefetchScalarGridSpec(
            num_scalar_prefetch=0,
            grid=(B, n_t),
            in_specs=[
                pl.BlockSpec((None, C, t_lanes), lambda b, t: (b, 0, t)),
                pl.BlockSpec((None, C, 1), lambda b, t: (b, 0, 0)),
            ],
            out_specs=pl.BlockSpec((None, C, t_lanes), lambda b, t: (b, 0, t)),
        ),
        compiler_params=pltpu.CompilerParams(
            dimension_semantics=("parallel", "parallel"),
            vmem_limit_bytes=vmem_limit,
        ),
        cost_estimate=pl.CostEstimate(
            flops=B * C * HW, transcendentals=0,
            bytes_accessed=2 * B * C * HW * itemsize + B * C * 4,
        ),
        input_output_aliases=({0: 0} if donate_x else {}),
    )(x_flat, gates)
    return out.reshape(B, C, H, W)


def _reference(x, w1, b1, w2, b2):
    y = jnp.mean(x, axis=(2, 3))                     # (B, C)
    h = jnp.maximum(y @ w1.T + b1, 0.0)
    s = jax.nn.sigmoid(h @ w2.T + b2)
    return x * s[:, :, None, None]


if __name__ == "__main__":
    key = jax.random.PRNGKey(0)

    def _make(B, C, H, W, ratio):
        hidden = max(C // ratio, 1)
        ks = jax.random.split(jax.random.fold_in(key, B * 1000 + H), 5)
        xx = jax.random.normal(ks[0], (B, C, H, W), dtype=jnp.float32)
        ww1 = jax.random.normal(ks[1], (hidden, C), dtype=jnp.float32) * 0.1
        bb1 = jax.random.normal(ks[2], (hidden,), dtype=jnp.float32) * 0.1
        ww2 = jax.random.normal(ks[3], (C, hidden), dtype=jnp.float32) * 0.1
        bb2 = jax.random.normal(ks[4], (C,), dtype=jnp.float32) * 0.1
        return xx, ww1, bb1, ww2, bb2

    # Case 1: fused path, HW a multiple of 128 (B=2 keeps 2 parallel grid steps).
    args = _make(2, 16, 16, 16, ratio=8)
    out = jax.block_until_ready(squeeze_excitation(*args))
    ref = _reference(*args)
    assert out.shape == args[0].shape
    assert jnp.allclose(out, ref, atol=1e-5, rtol=1e-5), "fused (aligned HW) mismatch"

    # Case 2: fused path with ragged HW (14*14=196, not a multiple of 128) and
    # multi-batch blocking (B=8 -> Bt=4, 2 grid steps) -- no pad / slice copies.
    args = _make(8, 16, 14, 14, ratio=8)
    out = jax.block_until_ready(squeeze_excitation(*args))
    ref = _reference(*args)
    assert jnp.allclose(out, ref, atol=1e-5, rtol=1e-5), "fused (ragged HW, Bt>1) mismatch"

    # Case 3: two-pass streaming fallback with a forced 128-lane tile so the
    # ragged-last-tile masking path (n_t=2, last tile of 68 valid lanes) runs.
    out2 = jax.block_until_ready(
        squeeze_excitation(*args, force_two_pass=True, _two_pass_tile_lanes=128))
    assert jnp.allclose(out2, ref, atol=1e-5, rtol=1e-5), "two-pass (ragged tile) mismatch"

    print("KERNEL_OK")
</pallas_src>

<mosaic_0001>
module attributes {stable_mosaic.version = 11 : i64} {
  func.func @_se_fused_kernel(%arg0: i32, %arg1: memref<1x16x256xf32, #tpu.memory_space<vmem>>, %arg2: memref<2x16xf32, #tpu.memory_space<vmem>>, %arg3: memref<2x1xf32, #tpu.memory_space<vmem>>, %arg4: memref<16x2xf32, #tpu.memory_space<vmem>>, %arg5: memref<16x1xf32, #tpu.memory_space<vmem>>, %arg6: memref<1x16x256xf32, #tpu.memory_space<vmem>>) attributes {dimension_semantics = [#tpu.dimension_semantics<parallel>], iteration_bounds = array<i64: 2>, scalar_prefetch = 0 : i64, scratch_operands = 0 : i64, tpu.core_type = #tpu.core_type<tc>, window_params = [{transform_indices = @transform_0, window_bounds = array<i64: 1, 16, 256>}, {pipeline_mode = #tpu.pipeline_mode<synchronous>, transform_indices = @transform_1, window_bounds = array<i64: 2, 16>}, {pipeline_mode = #tpu.pipeline_mode<synchronous>, transform_indices = @transform_2, window_bounds = array<i64: 2, 1>}, {pipeline_mode = #tpu.pipeline_mode<synchronous>, transform_indices = @transform_3, window_bounds = array<i64: 16, 2>}, {pipeline_mode = #tpu.pipeline_mode<synchronous>, transform_indices = @transform_4, window_bounds = array<i64: 16, 1>}, {transform_indices = @transform_5, window_bounds = array<i64: 1, 16, 256>}]} {
    %c0 = arith.constant 0 : index
    %c0_0 = arith.constant 0 : index
    %c0_1 = arith.constant 0 : index
    %0 = vector.load %arg1[%c0, %c0_0, %c0_1] : memref<1x16x256xf32, #tpu.memory_space<vmem>>, vector<1x16x256xf32>
    %1 = vector.shape_cast %0 : vector<1x16x256xf32> to vector<16x256xf32>
    %cst = arith.constant dense<0.000000e+00> : vector<16xf32>
    %2 = vector.multi_reduction <add>, %1, %cst [1] : vector<16x256xf32> to vector<16xf32>
    %3 = vector.shape_cast %2 : vector<16xf32> to vector<16x1xf32>
    %cst_2 = arith.constant 3.906250e-03 : f32
    %4 = vector.broadcast %cst_2 : f32 to vector<16x1xf32>
    %5 = arith.mulf %3, %4 : vector<16x1xf32>
    %c0_3 = arith.constant 0 : index
    %c0_4 = arith.constant 0 : index
    %6 = vector.load %arg2[%c0_3, %c0_4] : memref<2x16xf32, #tpu.memory_space<vmem>>, vector<2x16xf32>
    %cst_5 = arith.constant dense<0.000000e+00> : vector<2x1xf32>
    %7 = tpu.matmul %6, %5, %cst_5 {dimension_numbers = #tpu.dot_dimension_numbers<[1], [0], [0], [1], [0, 0, 1, 1], [], []>} : vector<2x16xf32>, vector<16x1xf32>, vector<2x1xf32> -> vector<2x1xf32>
    %c0_6 = arith.constant 0 : index
    %c0_7 = arith.constant 0 : index
    %8 = vector.load %arg3[%c0_6, %c0_7] : memref<2x1xf32, #tpu.memory_space<vmem>>, vector<2x1xf32>
    %9 = arith.addf %7, %8 : vector<2x1xf32>
    %cst_8 = arith.constant 0.000000e+00 : f32
    %10 = vector.broadcast %cst_8 : f32 to vector<2x1xf32>
    %11 = arith.maximumf %9, %10 : vector<2x1xf32>
    %c0_9 = arith.constant 0 : index
    %c0_10 = arith.constant 0 : index
    %12 = vector.load %arg4[%c0_9, %c0_10] : memref<16x2xf32, #tpu.memory_space<vmem>>, vector<16x2xf32>
    %cst_11 = arith.constant dense<0.000000e+00> : vector<16x1xf32>
    %13 = tpu.matmul %12, %11, %cst_11 {dimension_numbers = #tpu.dot_dimension_numbers<[1], [0], [0], [1], [0, 0, 1, 1], [], []>} : vector<16x2xf32>, vector<2x1xf32>, vector<16x1xf32> -> vector<16x1xf32>
    %c0_12 = arith.constant 0 : index
    %c0_13 = arith.constant 0 : index
    %14 = vector.load %arg5[%c0_12, %c0_13] : memref<16x1xf32, #tpu.memory_space<vmem>>, vector<16x1xf32>
    %15 = arith.addf %13, %14 : vector<16x1xf32>
    %16 = arith.negf %15 : vector<16x1xf32>
    %17 = math.exp %16 : vector<16x1xf32>
    %cst_14 = arith.constant 1.000000e+00 : f32
    %18 = vector.broadcast %cst_14 : f32 to vector<16x1xf32>
    %19 = arith.addf %18, %17 : vector<16x1xf32>
    %20 = arith.divf %18, %19 : vector<16x1xf32>
    %c0_15 = arith.constant 0 : index
    %c0_16 = arith.constant 0 : index
    %c0_17 = arith.constant 0 : index
    %21 = vector.load %arg1[%c0_15, %c0_16, %c0_17] : memref<1x16x256xf32, #tpu.memory_space<vmem>>, vector<1x16x256xf32>
    %22 = vector.shape_cast %21 : vector<1x16x256xf32> to vector<16x256xf32>
    %23 = vector.broadcast %20 : vector<16x1xf32> to vector<16x256xf32>
    %24 = arith.mulf %22, %23 : vector<16x256xf32>
    %c0_18 = arith.constant 0 : index
    %c0_19 = arith.constant 0 : index
    %c0_20 = arith.constant 0 : index
    %25 = vector.load %arg6[%c0_18, %c0_19, %c0_20] : memref<1x16x256xf32, #tpu.memory_space<vmem>>, vector<1x16x256xf32>
    %26 = vector.shape_cast %25 : vector<1x16x256xf32> to vector<16x256xf32>
    %27 = vector.shape_cast %24 : vector<16x256xf32> to vector<1x16x256xf32>
    tpu.vector_store %arg6[%c0_18, %c0_19, %c0_20], %27 {strides = array<i32>} : memref<1x16x256xf32, #tpu.memory_space<vmem>>, vector<1x16x256xf32>,
    return
  }
  func.func @transform_0(%arg0: i32) -> (i32, i32, i32) {
    %c0_i32 = arith.constant 0 : i32
    %c0_i32_0 = arith.constant 0 : i32
    %c0_i32_1 = arith.constant 0 : i32
    return %arg0, %c0_i32, %c0_i32_0 : i32, i32, i32
  }
  func.func @transform_1(%arg0: i32) -> (i32, i32) {
    %c0_i32 = arith.constant 0 : i32
    %c0_i32_0 = arith.constant 0 : i32
    %c0_i32_1 = arith.constant 0 : i32
    return %c0_i32, %c0_i32_0 : i32, i32
  }
  func.func @transform_2(%arg0: i32) -> (i32, i32) {
    %c0_i32 = arith.constant 0 : i32
    %c0_i32_0 = arith.constant 0 : i32
    %c0_i32_1 = arith.constant 0 : i32
    return %c0_i32, %c0_i32_0 : i32, i32
  }
  func.func @transform_3(%arg0: i32) -> (i32, i32) {
    %c0_i32 = arith.constant 0 : i32
    %c0_i32_0 = arith.constant 0 : i32
    %c0_i32_1 = arith.constant 0 : i32
    return %c0_i32, %c0_i32_0 : i32, i32
  }
  func.func @transform_4(%arg0: i32) -> (i32, i32) {
    %c0_i32 = arith.constant 0 : i32
    %c0_i32_0 = arith.constant 0 : i32
    %c0_i32_1 = arith.constant 0 : i32
    return %c0_i32, %c0_i32_0 : i32, i32
  }
  func.func @transform_5(%arg0: i32) -> (i32, i32, i32) {
    %c0_i32 = arith.constant 0 : i32
    %c0_i32_0 = arith.constant 0 : i32
    %c0_i32_1 = arith.constant 0 : i32
    return %arg0, %c0_i32, %c0_i32_0 : i32, i32, i32
  }
}

</mosaic_0001>

<bundles_post_ra>
// kernel: tpu_custom_call.1
= control target key start
LH: loop header
LB: loop body
LE: loop exit
PB: predicated region body
PF: predicated region fallthrough
CT: control target
= control target key end

     0   :  { %10 = vsyncpa [#allocation3], 0  ;;  %s959_s0 = inlined_call_operand.hbm [shape: f32[2,16,256], index: 0, kind: input, shape index: {}]   ;;  %s960_s1 = inlined_call_operand.vmem [shape: f32[2,16], index: 1, kind: input, shape index: {}]   ;;  %s961_s2 = inlined_call_operand.vmem [shape: f32[2,1], index: 2, kind: input, shape index: {}]   ;;  %s962_s3 = inlined_call_operand.vmem [shape: f32[16,2], index: 3, kind: input, shape index: {}]   ;;  %s963_s4 = inlined_call_operand.vmem [shape: f32[16,1], index: 4, kind: input, shape index: {}]   ;;  %s964_s5 = inlined_call_operand.hbm [shape: f32[2,16,256], index: 5, kind: output, shape index: {}]  }
   0x1   :  { %12 = vsyncpa [#allocation3 + $0x1], 0 }
   0x2   :  { %13 = vsyncpa [#allocation4], 0 }
   0x3   :  { %15 = vsyncpa [#allocation4 + $0x1], 0  ;;  %s775_s18 = smov 0   ;;  %s777_s19 = smov 0  }
   0x4   :  { %s779_s20 = smov 0   ;;  %s781_s21 = smov 0  }
   0x5 LB: > { %s796_s22 = sadd.s32 4294967295, %s734_s21   ;;  %s539_s23 = sadd.s32 4294967294, %s734_s21   ;;  %s734_s21 = sphi %s781_s21, %s979_s21   ;;  %s730_s20 = sphi %s779_s20, %s978_s20   ;;  %s726_s19 = sphi %s777_s19, %s977_s19   ;;  %s722_s18 = sphi %s775_s18, %s976_s18  }
   0x6   : > { %s800_s24 = sadd.s32 1, %s734_s21   ;;  %s28_s25 = sadd.s32 1, %s730_s20 }
   0x7   : > { %s25_s26 = ssub.s32 %s734_s21, %s800_s24  ;;  %p35_p0 = scmp.ne.s32.totalorder %s730_s20, %s726_s19 }
   0x8   : > { %p26_p1 = scmp.eq.s32.totalorder %s25_s26, 0  ;;  %p36_p2 = scmp.eq.s32.totalorder %s734_s21, 0 }
   0x9   : > { %p41_p3 = scmp.ne.s32.totalorder %s726_s19, %s722_s18  ;;  %p42_p4 = scmp.eq.s32.totalorder %s796_s22, 0 }
   0xa   : > { %s812_s27 = scalar_select %p26_p1, %s730_s20, %s28_s25  }
   0xb   : > { %p814_p5 = por %p36_p2, %p35_p0  ;;  %p818_p6 = por %p42_p4, %p41_p3 }
   0xc   : > { %p149_p7 = scmp.eq.s32.totalorder %s796_s22, 1  ;;  %p155_p8 = scmp.eq.s32.totalorder %s539_s23, 1 }
   0xd   : > { %s968_s29 = scalar_select %p818_p6, 1, 0 }
   0xe   : > { %p591_p10 = scmp.lt.s32.totalorder %s734_s21, 2  ;;  %p825_p11 = por %p149_p7, %p35_p0 }
   0xf   : > { %p829_p12 = por %p155_p8, %p41_p3  ;;  %s187_s7 = sand.u32 1, %s730_s20  }
  0x10   : > { %s969_s30 = scalar_select %p825_p11, 1, 0 }
  0x11   : > { %s970_s6 = scalar_select %p829_p12, 1, 0 }
  0x12   : > { %s559_s8 = sshll.u32 %s734_s21, 9  ;;  %s542_s9 = sshll.u32 %s187_s7, 5 }
  0x13   : > { %s838_s12 = scalar_lea.hbm %s959_s0, %s559_s8  ;;  %s191_s13 = scalar_lea.vmem [#allocation2], %s542_s9 }
  0x14   : > { %s198_s14 = sshll.u32 %s191_s13, 4  ;;  %p842_p13 = pnand %p591_p10, %p814_p5  ;;  %s846_s14 = int_to_ptr.vmem [resolvable:$true] %s198_s14 }
  0x15   : > { %s848_s16 = scalar_lea.sflag [#allocation3], %s187_s7  ;;  %s642_s17 = scalar_lea.hbm %s838_s12, 512 }
  0x16   : > { %p643_p0 = scmp.ne.s32.totalorder %s838_s12, %s642_s17  ;;  %p644_p1 = pneg %p842_p13 }
  0x17   : > { %s647_s26 = scalar_lea.hbm %s959_s0, 1024  ;;  %p648_p4 = scmp.lt.s32.totalorder %s838_s12, %s959_s0 }
  0x18   : > { %p645_p2 = pnand %p644_p1, %p643_p0  ;;  %p649_p5 = scmp.lt.s32.totalorder %s647_s26, %s642_s17 }
  0x1a   : > { %p646_p3 = pneg %p645_p2  ;;  %p650_p7 = por %p649_p5, %p648_p4 }
  0x1c   : > { %p651_p8 = pnand %p650_p7, %p646_p3 }
  0x1e   : > { %654 = shalt.err (!%p651_p8)
}
  0x1f   : > { %s655_s7 = scalar_lea.vmem %s846_s14, 512  ;;  %s736_s9 = smov [#allocation2]  }
  0x20   : > { %p656_p10 = scmp.ne.s32.totalorder %s846_s14, %s655_s7  ;;  %s660_s10 = sshll.u32 %s736_s9, 4  ;;  %s661_s10 = int_to_ptr.vmem [resolvable:$false] %s660_s10 }
  0x21   : > { %s662_s11 = scalar_lea.vmem %s661_s10, 1024  ;;  %p663_p2 = scmp.lt.s32.totalorder %s846_s14, %s661_s10 }
  0x22   : > { %p658_p9 = pnand %p656_p10, %p644_p1  ;;  %p664_p12 = scmp.lt.s32.totalorder %s662_s11, %s655_s7 }
  0x24   : > { %p659_p0 = pneg %p658_p9  ;;  %p665_p11 = por %p664_p12, %p663_p2 }
  0x26   : > { %p666_p6 = pnand %p665_p11, %p659_p0 }
  0x28   : > { %669 = shalt.err (!%p666_p6)
}
  0x29   : > { %s737_s13 = smov 256   ;;  %s738_s17 = smov 16  }
  0x2a   : > { %586 = dma.hbm_to_vmem [thread:$0]  (!%p842_p13), %s838_s12, 512, %s846_s14, %s848_s16, %s737_s13, %s737_s13, %s738_s17  }
  0x2b   : > { %p545_p9 = scmp.ge.s32.totalorder %s734_s21, 1  ;;  %p206_p1 = scmp.lt.s32.totalorder %s734_s21, 3 }
  0x2d   : > { %p207_p3 = pnand %p545_p9, %p206_p1 }
  0x2e   : > { %s872_s23 = sand.u32 (!%p207_p3), 1, %s726_s19   ;;  %p972_p6 = scmp.ne.s32.totalorder (!%p207_p3), %s968_s29, 0 }
  0x2f   : > { %210 = sbr.rel (%p207_p3) target bundleno = 773 (0x305), region = 40  ;;  %s546_s25 = sshll.u32 (!%p207_p3), %s872_s23, 5 }
  0x30   : > { %s213_s26 = scalar_lea.sflag (!%p207_p3), [#allocation3], %s872_s23  ;;  %s216_s28 = scalar_lea.vmem (!%p207_p3), [#allocation2], %s546_s25 }
  0x34   : > { %713 = dma.done.wait (%p972_p6), %s213_s26, 512  }
  0x35   : > { %715 = vsyncadd (%p972_p6), %s213_s26, 4294966784  ;;  %v882_v0 = vld [vmem:[%s216_s28 + $0x10] sm:$0xff]  ;;  %v884_v1 = vld [vmem:[%s216_s28 + $0x18] sm:$0xff]  ;;  %v739_v6 = vmov 0.0   ;;  %vm740_vm0 = vmmov 0   ;;  %vm257_vm1 = vcmask 130048  }
  0x36   : > { %v243_v2 = vld [vmem:[%s216_s28] sm:$0xff]  ;;  %v250_v3 = vadd.f32 %v884_v1, %v882_v0  ;;  %v244_v4 = vld [vmem:[%s216_s28 + $0x8] sm:$0xff]  ;;  %567 = vmatprep.subr.mxu0 %v739_v6  ;;  %571 = vmatprep.mubr.msk.f32.mxu0 %vm740_vm0, %v739_v6  ;;  %vm336_vm2 = vcmask 15360   ;;  %vm343_vm3 = vcmask 1041408   ;;  %v741_v19 = vmov 0   ;;  %s242_s26 = scalar_lea.vmem [#allocation5], %s546_s25 }
  0x37   : > { %v247_v5 = vadd.f32 %v244_v4, %v243_v2  ;;  %v255_v11 = vld [vmem:[%s960_s1] sm:$0x3]  ;;  %v333_v18 = vld [vmem:[%s962_s3 + $0x8] sm:$0xff]  ;;  %632 = vset.pattern.permute.xlu1 %v741_v19  ;;  %633 = vset.pattern.permute.xlu0 %v741_v19  ;;  %s466_s28 = sshll.u32 %s242_s26, 4  ;;  %s560_s29 = sshll.u32 %s796_s22, 9  ;;  %s909_s28 = int_to_ptr.vmem [resolvable:$true] %s466_s28 }
  0x38   : > { %251 = vadd.xlane.f32.xlu0 %v250_v3  ;;  %v332_v12 = vld [vmem:[%s962_s3] sm:$0xff]  ;;  %v335_v20 = vld [vmem:[%s963_s4 + $0x8] sm:$0xff]  ;;  %s914_s15 = scalar_lea.hbm %s964_s5, %s560_s29  ;;  %s453_s22 = scalar_lea.sflag [#allocation4], %s872_s23 }
  0x39   : > { %576 = vmatprep.mubr.msk.f32.mxu1 %vm336_vm2, %v332_v12  ;;  %v256_v13 = vld [vmem:[%s961_s2] sm:$0x3]  ;;  %s670_s25 = scalar_lea.vmem %s909_s28, 512  ;;  %p973_p12 = scmp.ne.s32.totalorder %s969_s30, 0 }
  0x3a   : > { %v334_v22 = vld [vmem:[%s963_s4] sm:$0xff]  ;;  %p671_p11 = scmp.ne.s32.totalorder %s909_s28, %s670_s25  ;;  %s742_s16 = smov [#allocation5]  }
  0x3b   : > { %s674_s8 = sshll.u32 %s742_s16, 4  ;;  %s675_s8 = int_to_ptr.vmem [resolvable:$false] %s674_s8 }
  0x3c   : > { %248 = vadd.xlane.f32.xlu0 %v247_v5  ;;  %p672_p13 = pnand %p671_p11, %p973_p12  ;;  %s676_s7 = scalar_lea.vmem %s675_s8, 1024 }
  0x3d   : > { %p677_p5 = scmp.lt.s32.totalorder %s909_s28, %s675_s8  ;;  %p678_p7 = scmp.lt.s32.totalorder %s676_s7, %s670_s25 }
  0x3e   : > { %p673_p4 = pneg %p672_p13 }
  0x3f   : > { %p679_p8 = por %p678_p7, %p677_p5 }
  0x41   : > { %p680_p10 = pnand %p679_p8, %p673_p4 }
  0xc1   : > { %v252_v7 = vpop.xlane.xlu0 %251 }
  0xc2   : > { %v254_v8 = vmul.f32 0.00390625, %v252_v7 }
  0xc4   : > { %568 = vmatpush3.msra.mxu0 %v254_v8 }
  0xc5   : > { %v249_v9 = vpop.xlane.xlu0 %248  ;;  %569 = vmatprep.subr.mxu0 %v739_v6 }
  0xc6   : > { %v253_v10 = vmul.f32 0.00390625, %v249_v9 }
  0xc8   : > { %570 = vmatpush3.msra.mxu0 %v253_v10 }
  0xc9   : > { %572 = vmatmul.mubr.msk.f32.vlgmr.msra.gmra.mxu0 %vm257_vm1, %v255_v11 }
 0x189   : > { %v327_v14 = vpop.f32.mrf.mxu0 }
 0x18a   : > { %v328_v15 = vadd.f32 %v327_v14, %v256_v13 }
 0x18b   : > { %v573_v16 = vpop.f32.mrf.mxu0 }
 0x18c   : > { %v331_v17 = vmax.f32 %v328_v15, 0.0 }
 0x18e   : > { %574 = vmatprep.subr.msk.mxu1 %vm343_vm3, %v331_v17 }
 0x18f   : > { %575 = vmatpush3.msk.msra.mxu1 %vm343_vm3, %v331_v17 }
 0x190   : > { %577 = vmatmul.mubr.msk.f32.vlgmr.msra.gmra.mxu1 %vm336_vm2, %v333_v18 }
 0x250   : > { %v578_v21 = vpop.f32.mrf.mxu1 }
 0x251   : > { %v419_v23 = vadd.f32 %v578_v21, %v335_v20 }
 0x252   : > { %v413_v24 = vpop.f32.mrf.mxu1 }
 0x253   : > { %v553_v25 = vmul.f32 -1.442695, %v419_v23  ;;  %v414_v26 = vadd.f32 %v413_v24, %v334_v22 }
 0x255   : > { %v552_v27 = vmul.f32 -1.442695, %v414_v26  ;;  %634 = vpow2.f32 %v553_v25 }
 0x257   : > { %636 = vpow2.f32 %v552_v27 }
 0x262   : > { %v635_v28 = vpop.eup %634 }
 0x263   : > { %v429_v31 = vadd.f32 1.0, %v635_v28 }
 0x264   : > { %v637_v29 = vpop.eup %636 }
 0x265   : > { %v428_v30 = vadd.f32 1.0, %v637_v29 }
 0x267   : > { %638 = vrcp.f32 %v428_v30 }
 0x268   : > { %640 = vrcp.f32 %v429_v31 }
 0x274   : > { %v639_v32 = vpop.eup %638 }
 0x275   : > { %436 = vperm.xlu1 %632, %v639_v32   ;;  %v641_v33 = vpop.eup %640 }
 0x279   : > { %441 = vperm.xlu1 %632, %v641_v33  }
 0x2f0   : > { %v437_v34 = vpop.permute.xlu1 %436 }
 0x2f1   : > { %v444_v35 = vmul.f32 %v437_v34, %v243_v2  ;;  %v445_v36 = vmul.f32 %v437_v34, %v244_v4 }
 0x2f3   : > { %448 = vst [vmem:[%s242_s26] sm:$0xff] %v444_v35  ;;  %449 = vst [vmem:[%s242_s26 + $0x8] sm:$0xff] %v445_v36 }
 0x2f4   : > { %v442_v37 = vpop.permute.xlu1 %441 }
 0x2f5   : > { %v446_v38 = vmul.f32 %v442_v37, %v882_v0  ;;  %v447_v39 = vmul.f32 %v442_v37, %v884_v1 }
 0x2f7   : > { %450 = vst [vmem:[%s242_s26 + $0x10] sm:$0xff] %v446_v38  ;;  %451 = vst [vmem:[%s242_s26 + $0x18] sm:$0xff] %v447_v39 }
 0x2f8   : > { %683 = shalt.err (!%p680_p10)
}
 0x2f9   : > { %s684_s9 = scalar_lea.hbm %s914_s15, 512  ;;  %s688_s13 = scalar_lea.hbm %s964_s5, 1024 }
 0x2fa   : > { %p685_p0 = scmp.ne.s32.totalorder %s914_s15, %s684_s9  ;;  %p689_p1 = scmp.lt.s32.totalorder %s914_s15, %s964_s5 }
 0x2fb   : > { %p690_p3 = scmp.lt.s32.totalorder %s688_s13, %s684_s9 }
 0x2fc   : > { %p686_p2 = pnand %p685_p0, %p973_p12 }
 0x2fd   : > { %p691_p6 = por %p690_p3, %p689_p1 }
 0x2fe   : > { %p687_p9 = pneg %p686_p2 }
 0x300   : > { %p692_p11 = pnand %p691_p6, %p687_p9 }
 0x302   : > { %695 = shalt.err (!%p692_p11)
}
 0x303   : > { %s743_s29 = smov 256   ;;  %s744_s12 = smov 16  }
 0x304   : > { %581 = dma.vmem_to_hbm [thread:$0]  (%p973_p12), %s909_s28, 512, %s914_s15, %s453_s22, %s743_s29, %s743_s29, %s744_s12  }
 0x305 PF: > { %s481_s14 = sand.u32 1, %s722_s18   ;;  %p974_p13 = scmp.ne.s32.totalorder %s970_s6, 0 }
 0x306   : > { %p975_p4 = scmp.ge.s32.totalorder %s734_s21, 2  ;;  %s482_s25 = scalar_lea.sflag [#allocation4], %s481_s14 }
 0x308   : > { %p588_p5 = pnand %p975_p4, %p974_p13 }
 0x30a   : > { %p589_p7 = pneg %p588_p5 }
 0x30c   : > { %717 = dma.done.wait (%p589_p7), %s482_s25, 512  }
 0x30d   : > { %719 = vsyncadd (%p589_p7), %s482_s25, 4294966784  ;;  %p18_p8 = scmp.ge.s32.totalorder %s800_s24, 4   ;;  %s976_s18 = smov %s726_s19 }
 0x30e   : > { %s977_s19 = smov %s730_s20  ;;  %s978_s20 = smov %s812_s27 }
 0x30f   : > { %s979_s21 = smov %s800_s24  ;;  %20 = sbr.rel (!%p18_p8) target bundleno = 5 (0x5), region = 85 }
 0x314   :  { %487 = vsyncpa [#allocation3], 1 }
 0x315   :  { %489 = vsyncpa [#allocation3 + $0x1], 1 }
 0x316   :  { %490 = vsyncpa [#allocation4], 1 }
 0x317   :  { %492 = vsyncpa [#allocation4 + $0x1], 1 }

</bundles_post_ra>
